<compile_context>
chip_gen: v5e
topology: v5e:2x2
jax: 0.10.0
libtpu: 0.0.40
codegen_flags: <defaults>
</compile_context>

<pallas_src>
import functools

import jax
import jax.numpy as jnp
from jax import lax
from jax.experimental import pallas as pl
from jax.experimental.pallas import tpu as pltpu


def _vmem_capacity_bytes():
    try:
        return int(pltpu.get_tpu_info().vmem_capacity_bytes)
    except Exception:
        return 64 * 1024 * 1024  # conservative default (v7x per-TC VMEM)


def _per_tile_bytes(tm, B, D, mxu_bytes):
    zi_in = 2 * tm * D * 4                              # double-buffered zi tile (f32)
    zi_tmp = 2 * tm * D * 4 + tm * D * mxu_bytes        # f32 copy + normalized + cast
    sim_tmp = 5 * tm * B * 4                            # sim, exp, 2x iota, select
    out_buf = 2 * tm * 128 * 4                          # per-row loss tiles (lane-padded)
    return zi_in + zi_tmp + sim_tmp + out_buf


def _pick_tm(B, D, mxu_bytes, budget):
    """Largest row-tile TM (multiple of 8, dividing B) fitting the VMEM budget."""
    resident = B * D * mxu_bytes  # single-buffered, mxu-dtype resident z_j
    candidates = [t for t in (1024, 512, 256, 128, 64, 32, 16, 8)
                  if t <= B and B % t == 0]
    for tm in candidates:
        if resident + _per_tile_bytes(tm, B, D, mxu_bytes) <= budget:
            return tm
    # TODO(synk): when the (single-buffered, mxu-dtype) resident z_j alone
    # exceeds the budget (very large B on v7x), add a second grid axis over
    # z_j column tiles with an online-softmax (running max / sum / diag)
    # accumulator instead of falling back here.
    return B if not candidates else candidates[-1]


def _vmem_limit_bytes(B, D, TM, mxu_bytes, cap):
    est = B * D * mxu_bytes + _per_tile_bytes(TM, B, D, mxu_bytes)
    est = int(est * 1.5) + (2 << 20)  # headroom for compiler temporaries
    return int(min(max(est, 24 * 1024 * 1024), cap))


def _contrastive_loss_kernel(zi_ref, zjn_ref, out_ref, *, inv_temp, mxu_dtype):
    i = pl.program_id(0)
    tm = zi_ref.shape[0]
    b = zjn_ref.shape[0]

    eps2 = jnp.float32(1e-24)  # (1e-12)^2; clamp sum-of-squares (sqrt monotone)

    # Normalize this zi row tile (f32), folding 1/temperature into the scale.
    zi = zi_ref[...].astype(jnp.float32)                                # [TM, D]
    zi_scale = lax.rsqrt(jnp.maximum(jnp.sum(zi * zi, axis=1, keepdims=True), eps2))
    zi_n = zi * (zi_scale * jnp.float32(inv_temp))                      # [TM, D]

    # sim[r, c] = <zi_n[r], zj_n[c]> / temp; contract the last dims of both
    # operands (MXU-native "NT" matmul, no transpose), f32 accumulation.
    sim = lax.dot_general(
        zi_n.astype(mxu_dtype), zjn_ref[...],
        dimension_numbers=(((1,), (1,)), ((), ())),
        preferred_element_type=jnp.float32)                             # [TM, B]

    # Correct-class logit sim[r, i*TM + r], extracted from `sim` itself so the
    # bf16 path uses the same (rounded) logits for the diagonal and logsumexp.
    col = lax.broadcasted_iota(jnp.int32, (tm, b), 1)
    row = lax.broadcasted_iota(jnp.int32, (tm, b), 0) + i * tm
    diag = jnp.sum(jnp.where(col == row, sim, jnp.float32(0.0)),
                   axis=1, keepdims=True)                               # [TM, 1]

    # Per-row cross-entropy: logsumexp(sim[r, :]) - sim[r, r_global].
    row_max = jnp.max(sim, axis=1, keepdims=True)
    lse = jnp.log(jnp.sum(jnp.exp(sim - row_max), axis=1, keepdims=True)) + row_max
    out_ref[...] = lse - diag


def _build_call(B, D, TM, kernel, vmem_limit, single_buffer_zj):
    num_tiles = B // TM
    zj_kwargs = {"pipeline_mode": pl.Buffered(1)} if single_buffer_zj else {}
    return pl.pallas_call(
        kernel,
        out_shape=jax.ShapeDtypeStruct((B, 1), jnp.float32),
        grid_spec=pltpu.PrefetchScalarGridSpec(
            num_scalar_prefetch=0,
            grid=(num_tiles,),
            in_specs=[
                pl.BlockSpec((TM, D), lambda i: (i, 0)),              # zi row tile
                pl.BlockSpec((B, D), lambda i: (0, 0), **zj_kwargs),  # resident zj_n
            ],
            out_specs=pl.BlockSpec((TM, 1), lambda i: (i, 0)),        # per-row losses
        ),
        compiler_params=pltpu.CompilerParams(
            dimension_semantics=("parallel",),  # no cross-tile dependence
            vmem_limit_bytes=vmem_limit,
        ),
    )


def contrastive_loss(z_i, z_j, temperature=0.1, *, mxu_dtype=jnp.bfloat16):
    assert z_i.shape == z_j.shape and z_i.ndim == 2
    B, D = z_i.shape
    mxu_bytes = jnp.dtype(mxu_dtype).itemsize
    eps2 = jnp.float32(1e-24)

    # Hoist z_j normalization + the MXU-dtype cast out of the per-tile loop:
    # one pass here instead of num_tiles redundant passes inside the kernel.
    zj = z_j.astype(jnp.float32)
    zj_n = (zj * lax.rsqrt(
        jnp.maximum(jnp.sum(zj * zj, axis=1, keepdims=True), eps2))).astype(mxu_dtype)
    zi = z_i.astype(jnp.float32)

    # Zero-pad D up to a multiple of 128 (lane width): zero columns change
    # neither norms nor dot products.
    D_pad = max(128, ((D + 127) // 128) * 128)
    if D_pad != D:
        zi = jnp.pad(zi, ((0, 0), (0, D_pad - D)))
        zj_n = jnp.pad(zj_n, ((0, 0), (0, D_pad - D)))

    cap = _vmem_capacity_bytes()
    TM = _pick_tm(B, D_pad, mxu_bytes, budget=cap * 3 // 4)
    vmem_limit = _vmem_limit_bytes(B, D_pad, TM, mxu_bytes, cap)

    kernel = functools.partial(_contrastive_loss_kernel,
                               inv_temp=float(1.0 / temperature),
                               mxu_dtype=mxu_dtype)

    try:
        per_row = _build_call(B, D_pad, TM, kernel, vmem_limit,
                              single_buffer_zj=True)(zi, zj_n)
    except Exception:
        # Fallback if this jax/Mosaic build rejects pl.Buffered(1); a genuine
        # kernel error would re-raise here identically.
        per_row = _build_call(B, D_pad, TM, kernel, vmem_limit,
                              single_buffer_zj=False)(zi, zj_n)

    # reduction='mean' over the B per-row cross-entropy losses.
    return jnp.mean(per_row)


def _reference_loss(z_i, z_j, temperature=0.1):
    # Pure-JAX reference mirroring the PyTorch module.
    eps = 1e-12
    zi = z_i / jnp.maximum(jnp.linalg.norm(z_i, axis=1, keepdims=True), eps)
    zj = z_j / jnp.maximum(jnp.linalg.norm(z_j, axis=1, keepdims=True), eps)
    sim = (zi @ zj.T) / temperature
    idx = jnp.arange(zi.shape[0])
    logp = jax.nn.log_softmax(sim, axis=1)
    return -jnp.mean(logp[idx, idx])


if __name__ == "__main__":
    key = jax.random.PRNGKey(0)
    k1, k2 = jax.random.split(key)
    B, D = 8, 32
    z_i = jax.random.normal(k1, (B, D), dtype=jnp.float32)
    z_j = jax.random.normal(k2, (B, D), dtype=jnp.float32)

    ref = _reference_loss(z_i, z_j, temperature=0.1)

    # Exact-math path (f32 MXU operands) — tight tolerance vs. the reference.
    loss_f32 = contrastive_loss(z_i, z_j, temperature=0.1, mxu_dtype=jnp.float32)
    jax.block_until_ready(loss_f32)
    assert jnp.allclose(loss_f32, ref, atol=1e-4, rtol=1e-4), (loss_f32, ref)

    # Default path: bf16 MXU operands (v6e/v7x throughput), f32 accumulation.
    loss_bf16 = contrastive_loss(z_i, z_j, temperature=0.1)
    jax.block_until_ready(loss_bf16)
    assert jnp.allclose(loss_bf16, ref, atol=5e-2, rtol=5e-2), (loss_bf16, ref)

    print("KERNEL_OK")
</pallas_src>

<mosaic_0001>
module attributes {stable_mosaic.version = 11 : i64} {
  func.func @_contrastive_loss_kernel(%arg0: i32, %arg1: memref<8x128xf32, #tpu.memory_space<vmem>>, %arg2: memref<8x128xf32, #tpu.memory_space<vmem>>, %arg3: memref<8x1xf32, #tpu.memory_space<vmem>>) attributes {dimension_semantics = [#tpu.dimension_semantics<parallel>], iteration_bounds = array<i64: 1>, scalar_prefetch = 0 : i64, scratch_operands = 0 : i64, tpu.core_type = #tpu.core_type<tc>, window_params = [{transform_indices = @transform_0, window_bounds = array<i64: 8, 128>}, {pipeline_mode = #tpu.pipeline_mode<synchronous>, transform_indices = @transform_1, window_bounds = array<i64: 8, 128>}, {transform_indices = @transform_2, window_bounds = array<i64: 8, 1>}]} {
    %c0 = arith.constant 0 : index
    %c0_0 = arith.constant 0 : index
    %0 = vector.load %arg1[%c0, %c0_0] : memref<8x128xf32, #tpu.memory_space<vmem>>, vector<8x128xf32>
    %1 = arith.mulf %0, %0 : vector<8x128xf32>
    %cst = arith.constant dense<0.000000e+00> : vector<8xf32>
    %2 = vector.multi_reduction <add>, %1, %cst [1] : vector<8x128xf32> to vector<8xf32>
    %3 = vector.shape_cast %2 : vector<8xf32> to vector<8x1xf32>
    %cst_1 = arith.constant 1.000000e-24 : f32
    %4 = vector.broadcast %cst_1 : f32 to vector<8x1xf32>
    %5 = arith.maximumf %3, %4 : vector<8x1xf32>
    %6 = math.rsqrt %5 : vector<8x1xf32>
    %cst_2 = arith.constant 1.000000e+01 : f32
    %7 = vector.broadcast %cst_2 : f32 to vector<8x1xf32>
    %8 = arith.mulf %6, %7 : vector<8x1xf32>
    %9 = vector.broadcast %8 : vector<8x1xf32> to vector<8x128xf32>
    %10 = arith.mulf %0, %9 : vector<8x128xf32>
    %c0_3 = arith.constant 0 : index
    %c0_4 = arith.constant 0 : index
    %11 = vector.load %arg2[%c0_3, %c0_4] : memref<8x128xf32, #tpu.memory_space<vmem>>, vector<8x128xf32>
    %cst_5 = arith.constant dense<0.000000e+00> : vector<8x8xf32>
    %12 = tpu.matmul %10, %11, %cst_5 {dimension_numbers = #tpu.dot_dimension_numbers<[1], [1], [0], [0], [0, 0, 1, 0], [], []>} : vector<8x128xf32>, vector<8x128xf32>, vector<8x8xf32> -> vector<8x8xf32>
    %13 = tpu.iota {dimensions = array<i32: 1>} : vector<8x8xi32>
    %14 = tpu.iota {dimensions = array<i32: 0>} : vector<8x8xi32>
    %c8_i32 = arith.constant 8 : i32
    %15 = arith.muli %arg0, %c8_i32 : i32
    %16 = vector.broadcast %15 : i32 to vector<8x8xi32>
    %17 = arith.addi %14, %16 : vector<8x8xi32>
    %18 = arith.cmpi eq, %13, %17 : vector<8x8xi32>
    %cst_6 = arith.constant 0.000000e+00 : f32
    %19 = vector.broadcast %cst_6 : f32 to vector<8x8xf32>
    %20 = arith.select %18, %12, %19 : vector<8x8xi1>, vector<8x8xf32>
    %cst_7 = arith.constant dense<0.000000e+00> : vector<8xf32>
    %21 = vector.multi_reduction <add>, %20, %cst_7 [1] : vector<8x8xf32> to vector<8xf32>
    %22 = vector.shape_cast %21 : vector<8xf32> to vector<8x1xf32>
    %cst_8 = arith.constant dense<0xFF800000> : vector<8xf32>
    %23 = vector.multi_reduction <maximumf>, %12, %cst_8 [1] : vector<8x8xf32> to vector<8xf32>
    %24 = vector.shape_cast %23 : vector<8xf32> to vector<8x1xf32>
    %25 = vector.broadcast %24 : vector<8x1xf32> to vector<8x8xf32>
    %26 = arith.subf %12, %25 : vector<8x8xf32>
    %27 = math.exp %26 : vector<8x8xf32>
    %cst_9 = arith.constant dense<0.000000e+00> : vector<8xf32>
    %28 = vector.multi_reduction <add>, %27, %cst_9 [1] : vector<8x8xf32> to vector<8xf32>
    %29 = vector.shape_cast %28 : vector<8xf32> to vector<8x1xf32>
    %30 = math.log %29 : vector<8x1xf32>
    %31 = arith.addf %30, %24 : vector<8x1xf32>
    %32 = arith.subf %31, %22 : vector<8x1xf32>
    %c0_10 = arith.constant 0 : index
    %c0_11 = arith.constant 0 : index
    %33 = vector.load %arg3[%c0_10, %c0_11] : memref<8x1xf32, #tpu.memory_space<vmem>>, vector<8x1xf32>
    tpu.vector_store %arg3[%c0_10, %c0_11], %32 {strides = array<i32>} : memref<8x1xf32, #tpu.memory_space<vmem>>, vector<8x1xf32>,
    return
  }
  func.func @transform_0(%arg0: i32) -> (i32, i32) {
    %c0_i32 = arith.constant 0 : i32
    %c0_i32_0 = arith.constant 0 : i32
    return %arg0, %c0_i32 : i32, i32
  }
  func.func @transform_1(%arg0: i32) -> (i32, i32) {
    %c0_i32 = arith.constant 0 : i32
    %c0_i32_0 = arith.constant 0 : i32
    %c0_i32_1 = arith.constant 0 : i32
    return %c0_i32, %c0_i32_0 : i32, i32
  }
  func.func @transform_2(%arg0: i32) -> (i32, i32) {
    %c0_i32 = arith.constant 0 : i32
    %c0_i32_0 = arith.constant 0 : i32
    return %arg0, %c0_i32 : i32, i32
  }
}

module attributes {stable_mosaic.version = 11 : i64} {
  func.func @_contrastive_loss_kernel(%arg0: i32, %arg1: memref<8x128xf32, #tpu.memory_space<vmem>>, %arg2: memref<8x128xf32, #tpu.memory_space<vmem>>, %arg3: memref<8x1xf32, #tpu.memory_space<vmem>>) attributes {dimension_semantics = [#tpu.dimension_semantics<parallel>], iteration_bounds = array<i64: 1>, scalar_prefetch = 0 : i64, scratch_operands = 0 : i64, tpu.core_type = #tpu.core_type<tc>, window_params = [{transform_indices = @transform_0, window_bounds = array<i64: 8, 128>}, {pipeline_mode = #tpu.pipeline_mode<synchronous>, transform_indices = @transform_1, window_bounds = array<i64: 8, 128>}, {transform_indices = @transform_2, window_bounds = array<i64: 8, 1>}]} {
    %c0 = arith.constant 0 : index
    %c0_0 = arith.constant 0 : index
    %0 = vector.load %arg1[%c0, %c0_0] : memref<8x128xf32, #tpu.memory_space<vmem>>, vector<8x128xf32>
    %1 = arith.mulf %0, %0 : vector<8x128xf32>
    %cst = arith.constant dense<0.000000e+00> : vector<8xf32>
    %2 = vector.multi_reduction <add>, %1, %cst [1] : vector<8x128xf32> to vector<8xf32>
    %3 = vector.shape_cast %2 : vector<8xf32> to vector<8x1xf32>
    %cst_1 = arith.constant 1.000000e-24 : f32
    %4 = vector.broadcast %cst_1 : f32 to vector<8x1xf32>
    %5 = arith.maximumf %3, %4 : vector<8x1xf32>
    %6 = math.rsqrt %5 : vector<8x1xf32>
    %cst_2 = arith.constant 1.000000e+01 : f32
    %7 = vector.broadcast %cst_2 : f32 to vector<8x1xf32>
    %8 = arith.mulf %6, %7 : vector<8x1xf32>
    %9 = vector.broadcast %8 : vector<8x1xf32> to vector<8x128xf32>
    %10 = arith.mulf %0, %9 : vector<8x128xf32>
    %c0_3 = arith.constant 0 : index
    %c0_4 = arith.constant 0 : index
    %11 = vector.load %arg2[%c0_3, %c0_4] : memref<8x128xf32, #tpu.memory_space<vmem>>, vector<8x128xf32>
    %cst_5 = arith.constant dense<0.000000e+00> : vector<8x8xf32>
    %12 = tpu.matmul %10, %11, %cst_5 {dimension_numbers = #tpu.dot_dimension_numbers<[1], [1], [0], [0], [0, 0, 1, 0], [], []>} : vector<8x128xf32>, vector<8x128xf32>, vector<8x8xf32> -> vector<8x8xf32>
    %13 = tpu.iota {dimensions = array<i32: 1>} : vector<8x8xi32>
    %14 = tpu.iota {dimensions = array<i32: 0>} : vector<8x8xi32>
    %c8_i32 = arith.constant 8 : i32
    %15 = arith.muli %arg0, %c8_i32 : i32
    %16 = vector.broadcast %15 : i32 to vector<8x8xi32>
    %17 = arith.addi %14, %16 : vector<8x8xi32>
    %18 = arith.cmpi eq, %13, %17 : vector<8x8xi32>
    %cst_6 = arith.constant 0.000000e+00 : f32
    %19 = vector.broadcast %cst_6 : f32 to vector<8x8xf32>
    %20 = arith.select %18, %12, %19 : vector<8x8xi1>, vector<8x8xf32>
    %cst_7 = arith.constant dense<0.000000e+00> : vector<8xf32>
    %21 = vector.multi_reduction <add>, %20, %cst_7 [1] : vector<8x8xf32> to vector<8xf32>
    %22 = vector.shape_cast %21 : vector<8xf32> to vector<8x1xf32>
    %cst_8 = arith.constant dense<0xFF800000> : vector<8xf32>
    %23 = vector.multi_reduction <maximumf>, %12, %cst_8 [1] : vector<8x8xf32> to vector<8xf32>
    %24 = vector.shape_cast %23 : vector<8xf32> to vector<8x1xf32>
    %25 = vector.broadcast %24 : vector<8x1xf32> to vector<8x8xf32>
    %26 = arith.subf %12, %25 : vector<8x8xf32>
    %27 = math.exp %26 : vector<8x8xf32>
    %cst_9 = arith.constant dense<0.000000e+00> : vector<8xf32>
    %28 = vector.multi_reduction <add>, %27, %cst_9 [1] : vector<8x8xf32> to vector<8xf32>
    %29 = vector.shape_cast %28 : vector<8xf32> to vector<8x1xf32>
    %30 = math.log %29 : vector<8x1xf32>
    %31 = arith.addf %30, %24 : vector<8x1xf32>
    %32 = arith.subf %31, %22 : vector<8x1xf32>
    %c0_10 = arith.constant 0 : index
    %c0_11 = arith.constant 0 : index
    %33 = vector.load %arg3[%c0_10, %c0_11] : memref<8x1xf32, #tpu.memory_space<vmem>>, vector<8x1xf32>
    tpu.vector_store %arg3[%c0_10, %c0_11], %32 {strides = array<i32>} : memref<8x1xf32, #tpu.memory_space<vmem>>, vector<8x1xf32>,
    return
  }
  func.func @transform_0(%arg0: i32) -> (i32, i32) {
    %c0_i32 = arith.constant 0 : i32
    %c0_i32_0 = arith.constant 0 : i32
    return %arg0, %c0_i32 : i32, i32
  }
  func.func @transform_1(%arg0: i32) -> (i32, i32) {
    %c0_i32 = arith.constant 0 : i32
    %c0_i32_0 = arith.constant 0 : i32
    %c0_i32_1 = arith.constant 0 : i32
    return %c0_i32, %c0_i32_0 : i32, i32
  }
  func.func @transform_2(%arg0: i32) -> (i32, i32) {
    %c0_i32 = arith.constant 0 : i32
    %c0_i32_0 = arith.constant 0 : i32
    return %arg0, %c0_i32 : i32, i32
  }
}

</mosaic_0001>

<bundles_post_ra>
// kernel: tpu_custom_call.1
= control target key start
LH: loop header
LB: loop body
LE: loop exit
PB: predicated region body
PF: predicated region fallthrough
CT: control target
= control target key end

     0   :  { %7 = vsyncpa [#allocation3], 0  ;;  %s200_s0 = inlined_call_operand.hbm [shape: f32[8,128], index: 0, kind: input, shape index: {}]   ;;  %s201_s1 = inlined_call_operand.hbm [shape: f32[8,128], index: 1, kind: input, shape index: {}]   ;;  %s202_s2 = inlined_call_operand.vmem [shape: f32[8,1], index: 2, kind: output, shape index: {}]  }
   0x1   :  { %s14_s11 = sshll.u32 %s200_s0, 4  ;;  %s15_s11 = int_to_ptr.hbm [resolvable:$true] %s14_s11 }
   0x2   :  { %8 = vsyncpa [#allocation5], 0  ;;  %s171_s12 = smov [#allocation2]   ;;  %s25_s16 = sshll.u32 %s201_s1, 4  ;;  %s26_s16 = int_to_ptr.hbm [resolvable:$true] %s25_s16 }
   0x3   :  { %s16_s13 = sshll.u32 %s171_s12, 4  ;;  %s172_s17 = smov [#allocation4]   ;;  %s17_s13 = int_to_ptr.vmem [resolvable:$true] %s16_s13 }
   0x4   :  { %19 = dma.hbm_to_vmem [thread:$0]  %s15_s11, 128, %s17_s13, [#allocation3]  }
   0x5   :  { %s27_s18 = sshll.u32 %s172_s17, 4  ;;  %s28_s18 = int_to_ptr.vmem [resolvable:$true] %s27_s18 }
   0x6   :  { %30 = dma.hbm_to_vmem [thread:$0]  %s26_s16, 128, %s28_s18, [#allocation5]  }
   0x7   :  { %167 = dma.done.wait [#allocation3], 128  }
   0x8   :  { %168 = vsyncadd [#allocation3], 4294967168 }
   0x9   :  { %169 = dma.done.wait [#allocation5], 128  }
   0xa   :  { %170 = vsyncadd [#allocation5], 4294967168  ;;  %v39_v0 = vld [vmem:[#allocation2] sm:$0xff]  ;;  %v56_v2 = vld [vmem:[#allocation4] sm:$0xff]  ;;  %vm86_vm3 = vcmask 64512   ;;  %v77_v19 = vlaneseq  ;;  %vm103_vm5 = vcmask 7168  }
   0xb   :  { %v40_v1 = vmul.f32 %v39_v0, %v39_v0  ;;  %72 = vmatpush.xpose.msra.mxu0 %v56_v2 }
   0xc   :  { %v78_v20 = vand.u32 127, %v77_v19  ;;  %v80_v21 = vshrl.u32 %v77_v19, 7 }
   0xd   :  { %41 = vadd.xlane.f32.xlu0 %v40_v1 }
   0xe   :  { %vm84_vm4 = vcmp.eq.s32.totalorder %v78_v20, %v80_v21 }
  0x80   :  { %v42_v3 = vpop.xlane.xlu0 %41 }
  0x81   :  { %v43_v4 = vmax.f32 %v42_v3, 1e-24 }
  0x83   :  { %113 = vrsqrt.f32 %v43_v4  ;;  %vm50_vm1 = vweird.f32 %v43_v4 }
  0x89   :  { %v114_v5 = vpop.eup %113 }
  0x8a   :  { %v45_v6 = vmul.f32 %v114_v5, %v43_v4  ;;  %vm51_vm0 = vweird.f32 %v114_v5 }
  0x8b   :  { %vm52_vm2 = vmor %vm50_vm1, %vm51_vm0 }
  0x8c   :  { %v46_v7 = vmul.f32 %v114_v5, %v45_v6 }
  0x8e   :  { %v47_v8 = vmul.f32 0.5, %v46_v7 }
  0x90   :  { %v48_v9 = vsub.f32 1.5, %v47_v8 }
  0x92   :  { %v49_v10 = vmul.f32 %v114_v5, %v48_v9 }
  0x94   :  { %v53_v11 = vsel %vm52_vm2, %v114_v5, %v49_v10 }
  0x95   :  { %v54_v12 = vmul.f32 10.0, %v53_v11 }
  0x97   :  { %v55_v13 = vmul.f32 %v54_v12, %v39_v0 }
  0x99   :  { %73 = vmatmul.f32.vlgmr.msra.gmra.mxu0 %v55_v13 }
 0x116   :  { %v74_v14 = vpop.f32.mrf.mxu0 }
 0x117   :  { %v90_v15 = vsel %vm86_vm3, %v74_v14, -inf  ;;  %v85_v24 = vsel %vm84_vm4, %v74_v14, 0.0 }
 0x118   :  { %91 = vmax.xlane.f32.xlu0 %v90_v15  ;;  %v87_v25 = vsel %vm86_vm3, %v85_v24, 0.0 }
 0x18b   :  { %v92_v16 = vpop.xlane.xlu0 %91 }
 0x18c   :  { %v93_v17 = vsub.f32 %v74_v14, %v92_v16 }
 0x18e   :  { %v94_v18 = vmul.f32 1.442695, %v93_v17 }
 0x190   :  { %115 = vpow2.f32 %v94_v18 }
 0x196   :  { %v116_v22 = vpop.eup %115 }
 0x197   :  { %v96_v23 = vsel %vm86_vm3, %v116_v22, 0.0 }
 0x198   :  { %97 = vadd.xlane.f32.xlu1 %v96_v23 }
 0x1a0   :  { %88 = vadd.xlane.f32.xlu1 %v87_v25 }
 0x20b   :  { %v98_v26 = vpop.xlane.xlu1 %97 }
 0x20c   :  { %117 = vlog2.f32 %v98_v26 }
 0x212   :  { %v118_v27 = vpop.eup %117 }
 0x213   :  { %v100_v28 = vmul.f32 0.6931472, %v118_v27  ;;  %v89_v30 = vpop.xlane.xlu1 %88 }
 0x215   :  { %v101_v29 = vadd.f32 %v100_v28, %v92_v16 }
 0x217   :  { %v102_v31 = vsub.f32 %v101_v29, %v89_v30 }
 0x219   :  { %104 = vst.msk [vmem:[%s202_s2] sm:$0xff] %vm103_vm5, %v102_v31 }
 0x21a   :  { %109 = vsyncpa [#allocation3], 1 }
 0x21b   :  { %110 = vsyncpa [#allocation5], 1 }

// kernel: tpu_custom_call.1
= control target key start
LH: loop header
LB: loop body
LE: loop exit
PB: predicated region body
PF: predicated region fallthrough
CT: control target
= control target key end

     0   :  { %7 = vsyncpa [#allocation3], 0  ;;  %s200_s0 = inlined_call_operand.hbm [shape: f32[8,128], index: 0, kind: input, shape index: {}]   ;;  %s201_s1 = inlined_call_operand.hbm [shape: f32[8,128], index: 1, kind: input, shape index: {}]   ;;  %s202_s2 = inlined_call_operand.vmem [shape: f32[8,1], index: 2, kind: output, shape index: {}]  }
   0x1   :  { %s14_s11 = sshll.u32 %s200_s0, 4  ;;  %s15_s11 = int_to_ptr.hbm [resolvable:$true] %s14_s11 }
   0x2   :  { %8 = vsyncpa [#allocation5], 0  ;;  %s171_s12 = smov [#allocation2]   ;;  %s25_s16 = sshll.u32 %s201_s1, 4  ;;  %s26_s16 = int_to_ptr.hbm [resolvable:$true] %s25_s16 }
   0x3   :  { %s16_s13 = sshll.u32 %s171_s12, 4  ;;  %s172_s17 = smov [#allocation4]   ;;  %s17_s13 = int_to_ptr.vmem [resolvable:$true] %s16_s13 }
   0x4   :  { %19 = dma.hbm_to_vmem [thread:$0]  %s15_s11, 128, %s17_s13, [#allocation3]  }
   0x5   :  { %s27_s18 = sshll.u32 %s172_s17, 4  ;;  %s28_s18 = int_to_ptr.vmem [resolvable:$true] %s27_s18 }
   0x6   :  { %30 = dma.hbm_to_vmem [thread:$0]  %s26_s16, 128, %s28_s18, [#allocation5]  }
   0x7   :  { %167 = dma.done.wait [#allocation3], 128  }
   0x8   :  { %168 = vsyncadd [#allocation3], 4294967168 }
   0x9   :  { %169 = dma.done.wait [#allocation5], 128  }
   0xa   :  { %170 = vsyncadd [#allocation5], 4294967168  ;;  %v39_v0 = vld [vmem:[#allocation2] sm:$0xff]  ;;  %v56_v2 = vld [vmem:[#allocation4] sm:$0xff]  ;;  %vm86_vm3 = vcmask 64512   ;;  %v77_v19 = vlaneseq  ;;  %vm103_vm5 = vcmask 7168  }
   0xb   :  { %v40_v1 = vmul.f32 %v39_v0, %v39_v0  ;;  %72 = vmatpush.xpose.msra.mxu0 %v56_v2 }
   0xc   :  { %v78_v20 = vand.u32 127, %v77_v19  ;;  %v80_v21 = vshrl.u32 %v77_v19, 7 }
   0xd   :  { %41 = vadd.xlane.f32.xlu0 %v40_v1 }
   0xe   :  { %vm84_vm4 = vcmp.eq.s32.totalorder %v78_v20, %v80_v21 }
  0x80   :  { %v42_v3 = vpop.xlane.xlu0 %41 }
  0x81   :  { %v43_v4 = vmax.f32 %v42_v3, 1e-24 }
  0x83   :  { %113 = vrsqrt.f32 %v43_v4  ;;  %vm50_vm1 = vweird.f32 %v43_v4 }
  0x89   :  { %v114_v5 = vpop.eup %113 }
  0x8a   :  { %v45_v6 = vmul.f32 %v114_v5, %v43_v4  ;;  %vm51_vm0 = vweird.f32 %v114_v5 }
  0x8b   :  { %vm52_vm2 = vmor %vm50_vm1, %vm51_vm0 }
  0x8c   :  { %v46_v7 = vmul.f32 %v114_v5, %v45_v6 }
  0x8e   :  { %v47_v8 = vmul.f32 0.5, %v46_v7 }
  0x90   :  { %v48_v9 = vsub.f32 1.5, %v47_v8 }
  0x92   :  { %v49_v10 = vmul.f32 %v114_v5, %v48_v9 }
  0x94   :  { %v53_v11 = vsel %vm52_vm2, %v114_v5, %v49_v10 }
  0x95   :  { %v54_v12 = vmul.f32 10.0, %v53_v11 }
  0x97   :  { %v55_v13 = vmul.f32 %v54_v12, %v39_v0 }
  0x99   :  { %73 = vmatmul.f32.vlgmr.msra.gmra.mxu0 %v55_v13 }
 0x116   :  { %v74_v14 = vpop.f32.mrf.mxu0 }
 0x117   :  { %v90_v15 = vsel %vm86_vm3, %v74_v14, -inf  ;;  %v85_v24 = vsel %vm84_vm4, %v74_v14, 0.0 }
 0x118   :  { %91 = vmax.xlane.f32.xlu0 %v90_v15  ;;  %v87_v25 = vsel %vm86_vm3, %v85_v24, 0.0 }
 0x18b   :  { %v92_v16 = vpop.xlane.xlu0 %91 }
 0x18c   :  { %v93_v17 = vsub.f32 %v74_v14, %v92_v16 }
 0x18e   :  { %v94_v18 = vmul.f32 1.442695, %v93_v17 }
 0x190   :  { %115 = vpow2.f32 %v94_v18 }
 0x196   :  { %v116_v22 = vpop.eup %115 }
 0x197   :  { %v96_v23 = vsel %vm86_vm3, %v116_v22, 0.0 }
 0x198   :  { %97 = vadd.xlane.f32.xlu1 %v96_v23 }
 0x1a0   :  { %88 = vadd.xlane.f32.xlu1 %v87_v25 }
 0x20b   :  { %v98_v26 = vpop.xlane.xlu1 %97 }
 0x20c   :  { %117 = vlog2.f32 %v98_v26 }
 0x212   :  { %v118_v27 = vpop.eup %117 }
 0x213   :  { %v100_v28 = vmul.f32 0.6931472, %v118_v27  ;;  %v89_v30 = vpop.xlane.xlu1 %88 }
 0x215   :  { %v101_v29 = vadd.f32 %v100_v28, %v92_v16 }
 0x217   :  { %v102_v31 = vsub.f32 %v101_v29, %v89_v30 }
 0x219   :  { %104 = vst.msk [vmem:[%s202_s2] sm:$0xff] %vm103_vm5, %v102_v31 }
 0x21a   :  { %109 = vsyncpa [#allocation3], 1 }
 0x21b   :  { %110 = vsyncpa [#allocation5], 1 }

</bundles_post_ra>
